<compile_context>
chip_gen: v6e
topology: v6e:2x2x1
jax: 0.10.0
libtpu: 0.0.40
codegen_flags: <defaults>
</compile_context>

<pallas_src>
import functools

import jax
import jax.numpy as jnp
from jax import lax
from jax.experimental import pallas as pl
from jax.experimental.pallas import tpu as pltpu


def _lstm_kernel(x_ref, wih_ref, whh_ref, b_ref, wfc_ref, bfc_ref,
                 y_ref, xg_scr, hs_scr, *, seq_len, batch_pad, hidden_size):
    S, Bp, H = seq_len, batch_pad, hidden_size

    # ---- Prologue: input projection for ALL timesteps (no sequential dep). ----
    # (S*Bp, IN) @ (IN, 4H) + bias  ->  (S*Bp, 4H) resident in VMEM scratch.
    xg_scr[...] = (jnp.dot(x_ref[...], wih_ref[...],
                           preferred_element_type=jnp.float32)
                   + b_ref[...])

    # Recurrent weight kept resident as a value across the unrolled loop.
    whh = whh_ref[...]                                   # (H, 4H)

    # Lane mask: gate order is (i, f, g, o); g (lanes [2H, 3H)) uses tanh,
    # the rest use sigmoid.  Apply both EUP functions on the full 128-lane
    # vector and select, instead of activating four 32-lane sub-slices.
    lane = lax.broadcasted_iota(jnp.int32, (Bp, 4 * H), 1)
    is_tanh_lane = (lane >= 2 * H) & (lane < 3 * H)

    def step(t, carry):
        h_prev, c_prev = carry
        r0 = pl.multiple_of(t * Bp, Bp)

        # Per-step serial work: one small MXU matmul + VPU/EUP elementwise.
        gates = xg_scr[pl.ds(r0, Bp), :] + jnp.dot(
            h_prev, whh, preferred_element_type=jnp.float32)      # (Bp, 4H)

        act = jnp.where(is_tanh_lane, jnp.tanh(gates), jax.nn.sigmoid(gates))

        i_g = act[:, 0 * H:1 * H]
        f_g = act[:, 1 * H:2 * H]
        g_g = act[:, 2 * H:3 * H]
        o_g = act[:, 3 * H:4 * H]

        c_new = f_g * c_prev + i_g * g_g
        h_new = o_g * jnp.tanh(c_new)

        hs_scr[pl.ds(r0, Bp), :] = h_new
        return h_new, c_new

    zeros = jnp.zeros((Bp, H), jnp.float32)
    lax.fori_loop(0, S, step, (zeros, zeros), unroll=True)

    # ---- Epilogue: Dropout (eval mode: identity), then one batched Linear. ----
    y = (jnp.dot(hs_scr[...], wfc_ref[...],
                 preferred_element_type=jnp.float32)
         + bfc_ref[...])
    y_ref[...] = y.astype(y_ref.dtype)


def lstm_rnn_forward(x, w_ih, w_hh, b_ih, b_hh, w_fc, b_fc):
    """x: (S, B, IN) float32.  Returns (S, B, OUT) float32."""
    S, B, IN = x.shape
    H4 = w_ih.shape[0]
    H = H4 // 4
    OUT = w_fc.shape[0]

    # Pad batch up to a sublane multiple (>=8) so vreg/MXU tiles are unmasked.
    B_pad = max(8, ((B + 7) // 8) * 8)
    x_p = jnp.zeros((S, B_pad, IN), jnp.float32).at[:, :B, :].set(
        x.astype(jnp.float32))
    x_flat = x_p.reshape(S * B_pad, IN)                  # row block t = timestep t

    # Pre-transpose weights so the kernel does plain (M,K)@(K,N) matmuls.
    wih_t = jnp.asarray(w_ih.T, jnp.float32)             # (IN, 4H)
    whh_t = jnp.asarray(w_hh.T, jnp.float32)             # (H, 4H)
    b = jnp.asarray((b_ih + b_hh)[None, :], jnp.float32)     # (1, 4H)
    wfc_t = jnp.asarray(w_fc.T, jnp.float32)             # (H, OUT)
    bfc = jnp.asarray(b_fc[None, :], jnp.float32)        # (1, OUT)

    kernel = functools.partial(_lstm_kernel, seq_len=S, batch_pad=B_pad,
                               hidden_size=H)

    y_flat = pl.pallas_call(
        kernel,
        out_shape=jax.ShapeDtypeStruct((S * B_pad, OUT), jnp.float32),
        grid=(1,),                                       # single invocation
        in_specs=[
            pl.BlockSpec((S * B_pad, IN), lambda i: (0, 0)),   # x (all steps)
            pl.BlockSpec((IN, 4 * H), lambda i: (0, 0)),       # W_ih^T
            pl.BlockSpec((H, 4 * H), lambda i: (0, 0)),        # W_hh^T
            pl.BlockSpec((1, 4 * H), lambda i: (0, 0)),        # b_ih + b_hh
            pl.BlockSpec((H, OUT), lambda i: (0, 0)),          # W_fc^T
            pl.BlockSpec((1, OUT), lambda i: (0, 0)),          # b_fc
        ],
        out_specs=pl.BlockSpec((S * B_pad, OUT), lambda i: (0, 0)),
        scratch_shapes=[
            pltpu.VMEM((S * B_pad, 4 * H), jnp.float32),   # precomputed x-gates
            pltpu.VMEM((S * B_pad, H), jnp.float32),       # all hidden states
        ],
        compiler_params=pltpu.CompilerParams(
            dimension_semantics=("arbitrary",)),
    )(x_flat, wih_t, whh_t, b, wfc_t, bfc)

    # Crop padded batch rows and restore (S, B, OUT).
    return y_flat.reshape(S, B_pad, OUT)[:, :B, :]


def lstm_rnn_reference(x, w_ih, w_hh, b_ih, b_hh, w_fc, b_fc):
    """Pure-JAX reference mirroring torch.nn.LSTM(num_layers=1) + Linear."""
    S, B, IN = x.shape
    H = w_hh.shape[1]

    def step(carry, x_t):
        h, c = carry
        gates = x_t @ w_ih.T + h @ w_hh.T + b_ih + b_hh
        i = jax.nn.sigmoid(gates[:, 0 * H:1 * H])
        f = jax.nn.sigmoid(gates[:, 1 * H:2 * H])
        g = jnp.tanh(gates[:, 2 * H:3 * H])
        o = jax.nn.sigmoid(gates[:, 3 * H:4 * H])
        c = f * c + i * g
        h = o * jnp.tanh(c)
        return (h, c), h

    (_, _), hs = jax.lax.scan(step, (jnp.zeros((B, H)), jnp.zeros((B, H))), x)
    y = hs.reshape(S * B, H) @ w_fc.T + b_fc
    return y.reshape(S, B, -1)


if __name__ == "__main__":
    # Small shapes consistent with the module's forward.
    SEQ, BATCH = 8, 2
    INPUT_SIZE, HIDDEN_SIZE, OUTPUT_SIZE = 16, 32, 8

    key = jax.random.PRNGKey(0)
    k_x, k_wih, k_whh, k_bih, k_bhh, k_wfc, k_bfc = jax.random.split(key, 7)

    # Deterministic parameter init (PyTorch-style U(-1/sqrt(H), 1/sqrt(H))).
    bound = 1.0 / jnp.sqrt(jnp.float32(HIDDEN_SIZE))
    w_ih = jax.random.uniform(k_wih, (4 * HIDDEN_SIZE, INPUT_SIZE),
                              minval=-bound, maxval=bound, dtype=jnp.float32)
    w_hh = jax.random.uniform(k_whh, (4 * HIDDEN_SIZE, HIDDEN_SIZE),
                              minval=-bound, maxval=bound, dtype=jnp.float32)
    b_ih = jax.random.uniform(k_bih, (4 * HIDDEN_SIZE,),
                              minval=-bound, maxval=bound, dtype=jnp.float32)
    b_hh = jax.random.uniform(k_bhh, (4 * HIDDEN_SIZE,),
                              minval=-bound, maxval=bound, dtype=jnp.float32)
    w_fc = jax.random.uniform(k_wfc, (OUTPUT_SIZE, HIDDEN_SIZE),
                              minval=-bound, maxval=bound, dtype=jnp.float32)
    b_fc = jax.random.uniform(k_bfc, (OUTPUT_SIZE,),
                              minval=-bound, maxval=bound, dtype=jnp.float32)

    x = jax.random.normal(k_x, (SEQ, BATCH, INPUT_SIZE), dtype=jnp.float32)

    out = lstm_rnn_forward(x, w_ih, w_hh, b_ih, b_hh, w_fc, b_fc)
    out = jax.block_until_ready(out)

    ref = lstm_rnn_reference(x, w_ih, w_hh, b_ih, b_hh, w_fc, b_fc)
    assert out.shape == (SEQ, BATCH, OUTPUT_SIZE)
    assert jnp.allclose(out, ref, atol=1e-5, rtol=1e-5), "mismatch vs reference"

    print("KERNEL_OK")
</pallas_src>

<mosaic_0001>
module attributes {stable_mosaic.version = 11 : i64} {
  func.func @_lstm_kernel(%arg0: i32, %arg1: memref<64x16xf32, #tpu.memory_space<vmem>>, %arg2: memref<16x128xf32, #tpu.memory_space<vmem>>, %arg3: memref<32x128xf32, #tpu.memory_space<vmem>>, %arg4: memref<1x128xf32, #tpu.memory_space<vmem>>, %arg5: memref<32x8xf32, #tpu.memory_space<vmem>>, %arg6: memref<1x8xf32, #tpu.memory_space<vmem>>, %arg7: memref<64x8xf32, #tpu.memory_space<vmem>>, %arg8: memref<64x128xf32, #tpu.memory_space<vmem>>, %arg9: memref<64x32xf32, #tpu.memory_space<vmem>>) attributes {dimension_semantics = [#tpu.dimension_semantics<arbitrary>], iteration_bounds = array<i64: 1>, scalar_prefetch = 0 : i64, scratch_operands = 2 : i64, tpu.core_type = #tpu.core_type<tc>, window_params = [{pipeline_mode = #tpu.pipeline_mode<synchronous>, transform_indices = @transform_0, window_bounds = array<i64: 64, 16>}, {pipeline_mode = #tpu.pipeline_mode<synchronous>, transform_indices = @transform_1, window_bounds = array<i64: 16, 128>}, {pipeline_mode = #tpu.pipeline_mode<synchronous>, transform_indices = @transform_2, window_bounds = array<i64: 32, 128>}, {pipeline_mode = #tpu.pipeline_mode<synchronous>, transform_indices = @transform_3, window_bounds = array<i64: 1, 128>}, {pipeline_mode = #tpu.pipeline_mode<synchronous>, transform_indices = @transform_4, window_bounds = array<i64: 32, 8>}, {pipeline_mode = #tpu.pipeline_mode<synchronous>, transform_indices = @transform_5, window_bounds = array<i64: 1, 8>}, {pipeline_mode = #tpu.pipeline_mode<synchronous>, transform_indices = @transform_6, window_bounds = array<i64: 64, 8>}]} {
    %c0 = arith.constant 0 : index
    %c0_0 = arith.constant 0 : index
    %0 = vector.load %arg1[%c0, %c0_0] : memref<64x16xf32, #tpu.memory_space<vmem>>, vector<64x16xf32>
    %c0_1 = arith.constant 0 : index
    %c0_2 = arith.constant 0 : index
    %1 = vector.load %arg2[%c0_1, %c0_2] : memref<16x128xf32, #tpu.memory_space<vmem>>, vector<16x128xf32>
    %cst = arith.constant dense<0.000000e+00> : vector<64x128xf32>
    %2 = tpu.matmul %0, %1, %cst {dimension_numbers = #tpu.dot_dimension_numbers<[1], [0], [0], [1], [0, 0, 1, 1], [], []>} : vector<64x16xf32>, vector<16x128xf32>, vector<64x128xf32> -> vector<64x128xf32>
    %c0_3 = arith.constant 0 : index
    %c0_4 = arith.constant 0 : index
    %3 = vector.load %arg4[%c0_3, %c0_4] : memref<1x128xf32, #tpu.memory_space<vmem>>, vector<1x128xf32>
    %4 = vector.broadcast %3 : vector<1x128xf32> to vector<64x128xf32>
    %5 = arith.addf %2, %4 : vector<64x128xf32>
    %c0_5 = arith.constant 0 : index
    %c0_6 = arith.constant 0 : index
    %6 = vector.load %arg8[%c0_5, %c0_6] : memref<64x128xf32, #tpu.memory_space<vmem>>, vector<64x128xf32>
    tpu.vector_store %arg8[%c0_5, %c0_6], %5 {strides = array<i32>} : memref<64x128xf32, #tpu.memory_space<vmem>>, vector<64x128xf32>,
    %c0_7 = arith.constant 0 : index
    %c0_8 = arith.constant 0 : index
    %7 = vector.load %arg3[%c0_7, %c0_8] : memref<32x128xf32, #tpu.memory_space<vmem>>, vector<32x128xf32>
    %8 = tpu.iota {dimensions = array<i32: 1>} : vector<8x128xi32>
    %c64_i32 = arith.constant 64 : i32
    %9 = vector.broadcast %c64_i32 : i32 to vector<8x128xi32>
    %10 = arith.cmpi sge, %8, %9 : vector<8x128xi32>
    %c96_i32 = arith.constant 96 : i32
    %11 = vector.broadcast %c96_i32 : i32 to vector<8x128xi32>
    %12 = arith.cmpi slt, %8, %11 : vector<8x128xi32>
    %13 = arith.andi %10, %12 : vector<8x128xi1>
    %cst_9 = arith.constant 0.000000e+00 : f32
    %14 = vector.broadcast %cst_9 : f32 to vector<8x32xf32>
    %c0_i32 = arith.constant 0 : i32
    %c8_i32 = arith.constant 8 : i32
    %15 = arith.muli %c0_i32, %c8_i32 : i32
    %16 = tpu.assume_multiple %15, 8 : i32
    %17 = arith.index_cast %16 : i32 to index
    %c0_10 = arith.constant 0 : index
    %18 = vector.load %arg8[%17, %c0_10] : memref<64x128xf32, #tpu.memory_space<vmem>>, vector<8x128xf32>
    %cst_11 = arith.constant dense<0.000000e+00> : vector<8x128xf32>
    %19 = tpu.matmul %14, %7, %cst_11 {dimension_numbers = #tpu.dot_dimension_numbers<[1], [0], [0], [1], [0, 0, 1, 1], [], []>} : vector<8x32xf32>, vector<32x128xf32>, vector<8x128xf32> -> vector<8x128xf32>
    %20 = arith.addf %18, %19 : vector<8x128xf32>
    %21 = math.tanh %20 : vector<8x128xf32>
    %22 = arith.negf %20 : vector<8x128xf32>
    %23 = math.exp %22 : vector<8x128xf32>
    %cst_12 = arith.constant 1.000000e+00 : f32
    %24 = vector.broadcast %cst_12 : f32 to vector<8x128xf32>
    %25 = arith.addf %24, %23 : vector<8x128xf32>
    %26 = arith.divf %24, %25 : vector<8x128xf32>
    %27 = arith.select %13, %21, %26 : vector<8x128xi1>, vector<8x128xf32>
    %28 = vector.extract_strided_slice %27 {offsets = [0, 0], sizes = [8, 32], strides = [1, 1]} : vector<8x128xf32> to vector<8x32xf32>
    %29 = vector.extract_strided_slice %27 {offsets = [0, 32], sizes = [8, 32], strides = [1, 1]} : vector<8x128xf32> to vector<8x32xf32>
    %30 = vector.extract_strided_slice %27 {offsets = [0, 64], sizes = [8, 32], strides = [1, 1]} : vector<8x128xf32> to vector<8x32xf32>
    %31 = vector.extract_strided_slice %27 {offsets = [0, 96], sizes = [8, 32], strides = [1, 1]} : vector<8x128xf32> to vector<8x32xf32>
    %32 = arith.mulf %29, %14 : vector<8x32xf32>
    %33 = arith.mulf %28, %30 : vector<8x32xf32>
    %34 = arith.addf %32, %33 : vector<8x32xf32>
    %35 = math.tanh %34 : vector<8x32xf32>
    %36 = arith.mulf %31, %35 : vector<8x32xf32>
    %37 = arith.index_cast %16 : i32 to index
    %c0_13 = arith.constant 0 : index
    %38 = vector.load %arg9[%37, %c0_13] : memref<64x32xf32, #tpu.memory_space<vmem>>, vector<8x32xf32>
    tpu.vector_store %arg9[%37, %c0_13], %36 {strides = array<i32>} : memref<64x32xf32, #tpu.memory_space<vmem>>, vector<8x32xf32>,
    %c1_i32 = arith.constant 1 : i32
    %c8_i32_14 = arith.constant 8 : i32
    %39 = arith.muli %c1_i32, %c8_i32_14 : i32
    %40 = tpu.assume_multiple %39, 8 : i32
    %41 = arith.index_cast %40 : i32 to index
    %c0_15 = arith.constant 0 : index
    %42 = vector.load %arg8[%41, %c0_15] : memref<64x128xf32, #tpu.memory_space<vmem>>, vector<8x128xf32>
    %cst_16 = arith.constant dense<0.000000e+00> : vector<8x128xf32>
    %43 = tpu.matmul %36, %7, %cst_16 {dimension_numbers = #tpu.dot_dimension_numbers<[1], [0], [0], [1], [0, 0, 1, 1], [], []>} : vector<8x32xf32>, vector<32x128xf32>, vector<8x128xf32> -> vector<8x128xf32>
    %44 = arith.addf %42, %43 : vector<8x128xf32>
    %45 = math.tanh %44 : vector<8x128xf32>
    %46 = arith.negf %44 : vector<8x128xf32>
    %47 = math.exp %46 : vector<8x128xf32>
    %cst_17 = arith.constant 1.000000e+00 : f32
    %48 = vector.broadcast %cst_17 : f32 to vector<8x128xf32>
    %49 = arith.addf %48, %47 : vector<8x128xf32>
    %50 = arith.divf %48, %49 : vector<8x128xf32>
    %51 = arith.select %13, %45, %50 : vector<8x128xi1>, vector<8x128xf32>
    %52 = vector.extract_strided_slice %51 {offsets = [0, 0], sizes = [8, 32], strides = [1, 1]} : vector<8x128xf32> to vector<8x32xf32>
    %53 = vector.extract_strided_slice %51 {offsets = [0, 32], sizes = [8, 32], strides = [1, 1]} : vector<8x128xf32> to vector<8x32xf32>
    %54 = vector.extract_strided_slice %51 {offsets = [0, 64], sizes = [8, 32], strides = [1, 1]} : vector<8x128xf32> to vector<8x32xf32>
    %55 = vector.extract_strided_slice %51 {offsets = [0, 96], sizes = [8, 32], strides = [1, 1]} : vector<8x128xf32> to vector<8x32xf32>
    %56 = arith.mulf %53, %34 : vector<8x32xf32>
    %57 = arith.mulf %52, %54 : vector<8x32xf32>
    %58 = arith.addf %56, %57 : vector<8x32xf32>
    %59 = math.tanh %58 : vector<8x32xf32>
    %60 = arith.mulf %55, %59 : vector<8x32xf32>
    %61 = arith.index_cast %40 : i32 to index
    %c0_18 = arith.constant 0 : index
    %62 = vector.load %arg9[%61, %c0_18] : memref<64x32xf32, #tpu.memory_space<vmem>>, vector<8x32xf32>
    tpu.vector_store %arg9[%61, %c0_18], %60 {strides = array<i32>} : memref<64x32xf32, #tpu.memory_space<vmem>>, vector<8x32xf32>,
    %c2_i32 = arith.constant 2 : i32
    %c8_i32_19 = arith.constant 8 : i32
    %63 = arith.muli %c2_i32, %c8_i32_19 : i32
    %64 = tpu.assume_multiple %63, 8 : i32
    %65 = arith.index_cast %64 : i32 to index
    %c0_20 = arith.constant 0 : index
    %66 = vector.load %arg8[%65, %c0_20] : memref<64x128xf32, #tpu.memory_space<vmem>>, vector<8x128xf32>
    %cst_21 = arith.constant dense<0.000000e+00> : vector<8x128xf32>
    %67 = tpu.matmul %60, %7, %cst_21 {dimension_numbers = #tpu.dot_dimension_numbers<[1], [0], [0], [1], [0, 0, 1, 1], [], []>} : vector<8x32xf32>, vector<32x128xf32>, vector<8x128xf32> -> vector<8x128xf32>
    %68 = arith.addf %66, %67 : vector<8x128xf32>
    %69 = math.tanh %68 : vector<8x128xf32>
    %70 = arith.negf %68 : vector<8x128xf32>
    %71 = math.exp %70 : vector<8x128xf32>
    %cst_22 = arith.constant 1.000000e+00 : f32
    %72 = vector.broadcast %cst_22 : f32 to vector<8x128xf32>
    %73 = arith.addf %72, %71 : vector<8x128xf32>
    %74 = arith.divf %72, %73 : vector<8x128xf32>
    %75 = arith.select %13, %69, %74 : vector<8x128xi1>, vector<8x128xf32>
    %76 = vector.extract_strided_slice %75 {offsets = [0, 0], sizes = [8, 32], strides = [1, 1]} : vector<8x128xf32> to vector<8x32xf32>
    %77 = vector.extract_strided_slice %75 {offsets = [0, 32], sizes = [8, 32], strides = [1, 1]} : vector<8x128xf32> to vector<8x32xf32>
    %78 = vector.extract_strided_slice %75 {offsets = [0, 64], sizes = [8, 32], strides = [1, 1]} : vector<8x128xf32> to vector<8x32xf32>
    %79 = vector.extract_strided_slice %75 {offsets = [0, 96], sizes = [8, 32], strides = [1, 1]} : vector<8x128xf32> to vector<8x32xf32>
    %80 = arith.mulf %77, %58 : vector<8x32xf32>
    %81 = arith.mulf %76, %78 : vector<8x32xf32>
    %82 = arith.addf %80, %81 : vector<8x32xf32>
    %83 = math.tanh %82 : vector<8x32xf32>
    %84 = arith.mulf %79, %83 : vector<8x32xf32>
    %85 = arith.index_cast %64 : i32 to index
    %c0_23 = arith.constant 0 : index
    %86 = vector.load %arg9[%85, %c0_23] : memref<64x32xf32, #tpu.memory_space<vmem>>, vector<8x32xf32>
    tpu.vector_store %arg9[%85, %c0_23], %84 {strides = array<i32>} : memref<64x32xf32, #tpu.memory_space<vmem>>, vector<8x32xf32>,
    %c3_i32 = arith.constant 3 : i32
    %c8_i32_24 = arith.constant 8 : i32
    %87 = arith.muli %c3_i32, %c8_i32_24 : i32
    %88 = tpu.assume_multiple %87, 8 : i32
    %89 = arith.index_cast %88 : i32 to index
    %c0_25 = arith.constant 0 : index
    %90 = vector.load %arg8[%89, %c0_25] : memref<64x128xf32, #tpu.memory_space<vmem>>, vector<8x128xf32>
    %cst_26 = arith.constant dense<0.000000e+00> : vector<8x128xf32>
    %91 = tpu.matmul %84, %7, %cst_26 {dimension_numbers = #tpu.dot_dimension_numbers<[1], [0], [0], [1], [0, 0, 1, 1], [], []>} : vector<8x32xf32>, vector<32x128xf32>, vector<8x128xf32> -> vector<8x128xf32>
    %92 = arith.addf %90, %91 : vector<8x128xf32>
    %93 = math.tanh %92 : vector<8x128xf32>
    %94 = arith.negf %92 : vector<8x128xf32>
    %95 = math.exp %94 : vector<8x128xf32>
    %cst_27 = arith.constant 1.000000e+00 : f32
    %96 = vector.broadcast %cst_27 : f32 to vector<8x128xf32>
    %97 = arith.addf %96, %95 : vector<8x128xf32>
    %98 = arith.divf %96, %97 : vector<8x128xf32>
    %99 = arith.select %13, %93, %98 : vector<8x128xi1>, vector<8x128xf32>
    %100 = vector.extract_strided_slice %99 {offsets = [0, 0], sizes = [8, 32], strides = [1, 1]} : vector<8x128xf32> to vector<8x32xf32>
    %101 = vector.extract_strided_slice %99 {offsets = [0, 32], sizes = [8, 32], strides = [1, 1]} : vector<8x128xf32> to vector<8x32xf32>
    %102 = vector.extract_strided_slice %99 {offsets = [0, 64], sizes = [8, 32], strides = [1, 1]} : vector<8x128xf32> to vector<8x32xf32>
    %103 = vector.extract_strided_slice %99 {offsets = [0, 96], sizes = [8, 32], strides = [1, 1]} : vector<8x128xf32> to vector<8x32xf32>
    %104 = arith.mulf %101, %82 : vector<8x32xf32>
    %105 = arith.mulf %100, %102 : vector<8x32xf32>
    %106 = arith.addf %104, %105 : vector<8x32xf32>
    %107 = math.tanh %106 : vector<8x32xf32>
    %108 = arith.mulf %103, %107 : vector<8x32xf32>
    %109 = arith.index_cast %88 : i32 to index
    %c0_28 = arith.constant 0 : index
    %110 = vector.load %arg9[%109, %c0_28] : memref<64x32xf32, #tpu.memory_space<vmem>>, vector<8x32xf32>
    tpu.vector_store %arg9[%109, %c0_28], %108 {strides = array<i32>} : memref<64x32xf32, #tpu.memory_space<vmem>>, vector<8x32xf32>,
    %c4_i32 = arith.constant 4 : i32
    %c8_i32_29 = arith.constant 8 : i32
    %111 = arith.muli %c4_i32, %c8_i32_29 : i32
    %112 = tpu.assume_multiple %111, 8 : i32
    %113 = arith.index_cast %112 : i32 to index
    %c0_30 = arith.constant 0 : index
    %114 = vector.load %arg8[%113, %c0_30] : memref<64x128xf32, #tpu.memory_space<vmem>>, vector<8x128xf32>
    %cst_31 = arith.constant dense<0.000000e+00> : vector<8x128xf32>
    %115 = tpu.matmul %108, %7, %cst_31 {dimension_numbers = #tpu.dot_dimension_numbers<[1], [0], [0], [1], [0, 0, 1, 1], [], []>} : vector<8x32xf32>, vector<32x128xf32>, vector<8x128xf32> -> vector<8x128xf32>
    %116 = arith.addf %114, %115 : vector<8x128xf32>
    %117 = math.tanh %116 : vector<8x128xf32>
    %118 = arith.negf %116 : vector<8x128xf32>
    %119 = math.exp %118 : vector<8x128xf32>
    %cst_32 = arith.constant 1.000000e+00 : f32
    %120 = vector.broadcast %cst_32 : f32 to vector<8x128xf32>
    %121 = arith.addf %120, %119 : vector<8x128xf32>
    %122 = arith.divf %120, %121 : vector<8x128xf32>
    %123 = arith.select %13, %117, %122 : vector<8x128xi1>, vector<8x128xf32>
    %124 = vector.extract_strided_slice %123 {offsets = [0, 0], sizes = [8, 32], strides = [1, 1]} : vector<8x128xf32> to vector<8x32xf32>
    %125 = vector.extract_strided_slice %123 {offsets = [0, 32], sizes = [8, 32], strides = [1, 1]} : vector<8x128xf32> to vector<8x32xf32>
    %126 = vector.extract_strided_slice %123 {offsets = [0, 64], sizes = [8, 32], strides = [1, 1]} : vector<8x128xf32> to vector<8x32xf32>
    %127 = vector.extract_strided_slice %123 {offsets = [0, 96], sizes = [8, 32], strides = [1, 1]} : vector<8x128xf32> to vector<8x32xf32>
    %128 = arith.mulf %125, %106 : vector<8x32xf32>
    %129 = arith.mulf %124, %126 : vector<8x32xf32>
    %130 = arith.addf %128, %129 : vector<8x32xf32>
    %131 = math.tanh %130 : vector<8x32xf32>
    %132 = arith.mulf %127, %131 : vector<8x32xf32>
    %133 = arith.index_cast %112 : i32 to index
    %c0_33 = arith.constant 0 : index
    %134 = vector.load %arg9[%133, %c0_33] : memref<64x32xf32, #tpu.memory_space<vmem>>, vector<8x32xf32>
    tpu.vector_store %arg9[%133, %c0_33], %132 {strides = array<i32>} : memref<64x32xf32, #tpu.memory_space<vmem>>, vector<8x32xf32>,
    %c5_i32 = arith.constant 5 : i32
    %c8_i32_34 = arith.constant 8 : i32
    %135 = arith.muli %c5_i32, %c8_i32_34 : i32
    %136 = tpu.assume_multiple %135, 8 : i32
    %137 = arith.index_cast %136 : i32 to index
    %c0_35 = arith.constant 0 : index
    %138 = vector.load %arg8[%137, %c0_35] : memref<64x128xf32, #tpu.memory_space<vmem>>, vector<8x128xf32>
    %cst_36 = arith.constant dense<0.000000e+00> : vector<8x128xf32>
    %139 = tpu.matmul %132, %7, %cst_36 {dimension_numbers = #tpu.dot_dimension_numbers<[1], [0], [0], [1], [0, 0, 1, 1], [], []>} : vector<8x32xf32>, vector<32x128xf32>, vector<8x128xf32> -> vector<8x128xf32>
    %140 = arith.addf %138, %139 : vector<8x128xf32>
    %141 = math.tanh %140 : vector<8x128xf32>
    %142 = arith.negf %140 : vector<8x128xf32>
    %143 = math.exp %142 : vector<8x128xf32>
    %cst_37 = arith.constant 1.000000e+00 : f32
    %144 = vector.broadcast %cst_37 : f32 to vector<8x128xf32>
    %145 = arith.addf %144, %143 : vector<8x128xf32>
    %146 = arith.divf %144, %145 : vector<8x128xf32>
    %147 = arith.select %13, %141, %146 : vector<8x128xi1>, vector<8x128xf32>
    %148 = vector.extract_strided_slice %147 {offsets = [0, 0], sizes = [8, 32], strides = [1, 1]} : vector<8x128xf32> to vector<8x32xf32>
    %149 = vector.extract_strided_slice %147 {offsets = [0, 32], sizes = [8, 32], strides = [1, 1]} : vector<8x128xf32> to vector<8x32xf32>
    %150 = vector.extract_strided_slice %147 {offsets = [0, 64], sizes = [8, 32], strides = [1, 1]} : vector<8x128xf32> to vector<8x32xf32>
    %151 = vector.extract_strided_slice %147 {offsets = [0, 96], sizes = [8, 32], strides = [1, 1]} : vector<8x128xf32> to vector<8x32xf32>
    %152 = arith.mulf %149, %130 : vector<8x32xf32>
    %153 = arith.mulf %148, %150 : vector<8x32xf32>
    %154 = arith.addf %152, %153 : vector<8x32xf32>
    %155 = math.tanh %154 : vector<8x32xf32>
    %156 = arith.mulf %151, %155 : vector<8x32xf32>
    %157 = arith.index_cast %136 : i32 to index
    %c0_38 = arith.constant 0 : index
    %158 = vector.load %arg9[%157, %c0_38] : memref<64x32xf32, #tpu.memory_space<vmem>>, vector<8x32xf32>
    tpu.vector_store %arg9[%157, %c0_38], %156 {strides = array<i32>} : memref<64x32xf32, #tpu.memory_space<vmem>>, vector<8x32xf32>,
    %c6_i32 = arith.constant 6 : i32
    %c8_i32_39 = arith.constant 8 : i32
    %159 = arith.muli %c6_i32, %c8_i32_39 : i32
    %160 = tpu.assume_multiple %159, 8 : i32
    %161 = arith.index_cast %160 : i32 to index
    %c0_40 = arith.constant 0 : index
    %162 = vector.load %arg8[%161, %c0_40] : memref<64x128xf32, #tpu.memory_space<vmem>>, vector<8x128xf32>
    %cst_41 = arith.constant dense<0.000000e+00> : vector<8x128xf32>
    %163 = tpu.matmul %156, %7, %cst_41 {dimension_numbers = #tpu.dot_dimension_numbers<[1], [0], [0], [1], [0, 0, 1, 1], [], []>} : vector<8x32xf32>, vector<32x128xf32>, vector<8x128xf32> -> vector<8x128xf32>
    %164 = arith.addf %162, %163 : vector<8x128xf32>
    %165 = math.tanh %164 : vector<8x128xf32>
    %166 = arith.negf %164 : vector<8x128xf32>
    %167 = math.exp %166 : vector<8x128xf32>
    %cst_42 = arith.constant 1.000000e+00 : f32
    %168 = vector.broadcast %cst_42 : f32 to vector<8x128xf32>
    %169 = arith.addf %168, %167 : vector<8x128xf32>
    %170 = arith.divf %168, %169 : vector<8x128xf32>
    %171 = arith.select %13, %165, %170 : vector<8x128xi1>, vector<8x128xf32>
    %172 = vector.extract_strided_slice %171 {offsets = [0, 0], sizes = [8, 32], strides = [1, 1]} : vector<8x128xf32> to vector<8x32xf32>
    %173 = vector.extract_strided_slice %171 {offsets = [0, 32], sizes = [8, 32], strides = [1, 1]} : vector<8x128xf32> to vector<8x32xf32>
    %174 = vector.extract_strided_slice %171 {offsets = [0, 64], sizes = [8, 32], strides = [1, 1]} : vector<8x128xf32> to vector<8x32xf32>
    %175 = vector.extract_strided_slice %171 {offsets = [0, 96], sizes = [8, 32], strides = [1, 1]} : vector<8x128xf32> to vector<8x32xf32>
    %176 = arith.mulf %173, %154 : vector<8x32xf32>
    %177 = arith.mulf %172, %174 : vector<8x32xf32>
    %178 = arith.addf %176, %177 : vector<8x32xf32>
    %179 = math.tanh %178 : vector<8x32xf32>
    %180 = arith.mulf %175, %179 : vector<8x32xf32>
    %181 = arith.index_cast %160 : i32 to index
    %c0_43 = arith.constant 0 : index
    %182 = vector.load %arg9[%181, %c0_43] : memref<64x32xf32, #tpu.memory_space<vmem>>, vector<8x32xf32>
    tpu.vector_store %arg9[%181, %c0_43], %180 {strides = array<i32>} : memref<64x32xf32, #tpu.memory_space<vmem>>, vector<8x32xf32>,
    %c7_i32 = arith.constant 7 : i32
    %c8_i32_44 = arith.constant 8 : i32
    %183 = arith.muli %c7_i32, %c8_i32_44 : i32
    %184 = tpu.assume_multiple %183, 8 : i32
    %185 = arith.index_cast %184 : i32 to index
    %c0_45 = arith.constant 0 : index
    %186 = vector.load %arg8[%185, %c0_45] : memref<64x128xf32, #tpu.memory_space<vmem>>, vector<8x128xf32>
    %cst_46 = arith.constant dense<0.000000e+00> : vector<8x128xf32>
    %187 = tpu.matmul %180, %7, %cst_46 {dimension_numbers = #tpu.dot_dimension_numbers<[1], [0], [0], [1], [0, 0, 1, 1], [], []>} : vector<8x32xf32>, vector<32x128xf32>, vector<8x128xf32> -> vector<8x128xf32>
    %188 = arith.addf %186, %187 : vector<8x128xf32>
    %189 = math.tanh %188 : vector<8x128xf32>
    %190 = arith.negf %188 : vector<8x128xf32>
    %191 = math.exp %190 : vector<8x128xf32>
    %cst_47 = arith.constant 1.000000e+00 : f32
    %192 = vector.broadcast %cst_47 : f32 to vector<8x128xf32>
    %193 = arith.addf %192, %191 : vector<8x128xf32>
    %194 = arith.divf %192, %193 : vector<8x128xf32>
    %195 = arith.select %13, %189, %194 : vector<8x128xi1>, vector<8x128xf32>
    %196 = vector.extract_strided_slice %195 {offsets = [0, 0], sizes = [8, 32], strides = [1, 1]} : vector<8x128xf32> to vector<8x32xf32>
    %197 = vector.extract_strided_slice %195 {offsets = [0, 32], sizes = [8, 32], strides = [1, 1]} : vector<8x128xf32> to vector<8x32xf32>
    %198 = vector.extract_strided_slice %195 {offsets = [0, 64], sizes = [8, 32], strides = [1, 1]} : vector<8x128xf32> to vector<8x32xf32>
    %199 = vector.extract_strided_slice %195 {offsets = [0, 96], sizes = [8, 32], strides = [1, 1]} : vector<8x128xf32> to vector<8x32xf32>
    %200 = arith.mulf %197, %178 : vector<8x32xf32>
    %201 = arith.mulf %196, %198 : vector<8x32xf32>
    %202 = arith.addf %200, %201 : vector<8x32xf32>
    %203 = math.tanh %202 : vector<8x32xf32>
    %204 = arith.mulf %199, %203 : vector<8x32xf32>
    %205 = arith.index_cast %184 : i32 to index
    %c0_48 = arith.constant 0 : index
    %206 = vector.load %arg9[%205, %c0_48] : memref<64x32xf32, #tpu.memory_space<vmem>>, vector<8x32xf32>
    tpu.vector_store %arg9[%205, %c0_48], %204 {strides = array<i32>} : memref<64x32xf32, #tpu.memory_space<vmem>>, vector<8x32xf32>,
    %c8_i32_49 = arith.constant 8 : i32
    %c0_50 = arith.constant 0 : index
    %c0_51 = arith.constant 0 : index
    %207 = vector.load %arg9[%c0_50, %c0_51] : memref<64x32xf32, #tpu.memory_space<vmem>>, vector<64x32xf32>
    %c0_52 = arith.constant 0 : index
    %c0_53 = arith.constant 0 : index
    %208 = vector.load %arg5[%c0_52, %c0_53] : memref<32x8xf32, #tpu.memory_space<vmem>>, vector<32x8xf32>
    %cst_54 = arith.constant dense<0.000000e+00> : vector<64x8xf32>
    %209 = tpu.matmul %207, %208, %cst_54 {dimension_numbers = #tpu.dot_dimension_numbers<[1], [0], [0], [1], [0, 0, 1, 1], [], []>} : vector<64x32xf32>, vector<32x8xf32>, vector<64x8xf32> -> vector<64x8xf32>
    %c0_55 = arith.constant 0 : index
    %c0_56 = arith.constant 0 : index
    %210 = vector.load %arg6[%c0_55, %c0_56] : memref<1x8xf32, #tpu.memory_space<vmem>>, vector<1x8xf32>
    %211 = vector.broadcast %210 : vector<1x8xf32> to vector<64x8xf32>
    %212 = arith.addf %209, %211 : vector<64x8xf32>
    %c0_57 = arith.constant 0 : index
    %c0_58 = arith.constant 0 : index
    %213 = vector.load %arg7[%c0_57, %c0_58] : memref<64x8xf32, #tpu.memory_space<vmem>>, vector<64x8xf32>
    tpu.vector_store %arg7[%c0_57, %c0_58], %212 {strides = array<i32>} : memref<64x8xf32, #tpu.memory_space<vmem>>, vector<64x8xf32>,
    return
  }
  func.func @transform_0(%arg0: i32) -> (i32, i32) {
    %c0_i32 = arith.constant 0 : i32
    %c0_i32_0 = arith.constant 0 : i32
    %c0_i32_1 = arith.constant 0 : i32
    return %c0_i32, %c0_i32_0 : i32, i32
  }
  func.func @transform_1(%arg0: i32) -> (i32, i32) {
    %c0_i32 = arith.constant 0 : i32
    %c0_i32_0 = arith.constant 0 : i32
    %c0_i32_1 = arith.constant 0 : i32
    return %c0_i32, %c0_i32_0 : i32, i32
  }
  func.func @transform_2(%arg0: i32) -> (i32, i32) {
    %c0_i32 = arith.constant 0 : i32
    %c0_i32_0 = arith.constant 0 : i32
    %c0_i32_1 = arith.constant 0 : i32
    return %c0_i32, %c0_i32_0 : i32, i32
  }
  func.func @transform_3(%arg0: i32) -> (i32, i32) {
    %c0_i32 = arith.constant 0 : i32
    %c0_i32_0 = arith.constant 0 : i32
    %c0_i32_1 = arith.constant 0 : i32
    return %c0_i32, %c0_i32_0 : i32, i32
  }
  func.func @transform_4(%arg0: i32) -> (i32, i32) {
    %c0_i32 = arith.constant 0 : i32
    %c0_i32_0 = arith.constant 0 : i32
    %c0_i32_1 = arith.constant 0 : i32
    return %c0_i32, %c0_i32_0 : i32, i32
  }
  func.func @transform_5(%arg0: i32) -> (i32, i32) {
    %c0_i32 = arith.constant 0 : i32
    %c0_i32_0 = arith.constant 0 : i32
    %c0_i32_1 = arith.constant 0 : i32
    return %c0_i32, %c0_i32_0 : i32, i32
  }
  func.func @transform_6(%arg0: i32) -> (i32, i32) {
    %c0_i32 = arith.constant 0 : i32
    %c0_i32_0 = arith.constant 0 : i32
    %c0_i32_1 = arith.constant 0 : i32
    return %c0_i32, %c0_i32_0 : i32, i32
  }
}

</mosaic_0001>

<bundles_post_ra>
// kernel: tpu_custom_call.1
= control target key start
LH: loop header
LB: loop body
LE: loop exit
PB: predicated region body
PF: predicated region fallthrough
CT: control target
= control target key end

     0   :  { %vm40_vm0 = vcmask 130048   ;;  %v1487_v6 = vmov 0.0   ;;  %vm1488_vm1 = vmmov 0   ;;  %v182_v27 = vlaneseq  ;;  %s1490_s21 = smov 32   ;;  %s1826_s1 = inlined_call_operand.vmem [shape: f32[16,128], index: 1, kind: input, shape index: {}]   ;;  %s1827_s0 = inlined_call_operand.vmem [shape: f32[64,16], index: 0, kind: input, shape index: {}]   ;;  %s1828_s2 = inlined_call_operand.vmem [shape: f32[32,128], index: 2, kind: input, shape index: {}]   ;;  %s1829_s3 = inlined_call_operand.vmem [shape: f32[1,128], index: 3, kind: input, shape index: {}]   ;;  %s1830_s4 = inlined_call_operand.vmem [shape: f32[32,8], index: 4, kind: input, shape index: {}]   ;;  %s1831_s5 = inlined_call_operand.vmem [shape: f32[1,8], index: 5, kind: input, shape index: {}]   ;;  %s1832_s6 = inlined_call_operand.vmem [shape: f32[64,8], index: 6, kind: output, shape index: {}]  }
   0x1   :  { %v32_v0 = vld [vmem:[%s1826_s1 + $0x8] sm:$0xff]  ;;  %v31_v1 = vld [vmem:[%s1826_s1] sm:$0xff]  ;;  %v1542_v4 = vld [vmem:[%s1828_s2 + $0x18] sm:$0xff]  ;;  %vm188_vm5 = vcmask 261120   ;;  %vm1183_vm6 = vcmask 64512  }
   0x2   :  { %v27_v2 = vld [vmem:[%s1827_s0 + $0x20] sm:$0xff]  ;;  %1415 = vmatprep.subr.mxu1 %v32_v0  ;;  %1291 = vmatprep.subr.mxu0 %v32_v0  ;;  %v28_v3 = vld [vmem:[%s1827_s0 + $0x28] sm:$0xff]  ;;  %v29_v8 = vld [vmem:[%s1827_s0 + $0x30] sm:$0xff]  ;;  %v183_v28 = vand.u32 127, %v182_v27 }
   0x3   :  { %1417 = vmatpush3.msra.mxu1 %v32_v0  ;;  %1301 = vmatprep.mubr.msk.f32.mxu1 %vm40_vm0, %v27_v2  ;;  %v23_v5 = vld [vmem:[%s1827_s0] sm:$0xff]  ;;  %v24_v7 = vld [vmem:[%s1827_s0 + $0x8] sm:$0xff]  ;;  %v1559_v9 = vld [vmem:[%s1828_s2 + $0x10] sm:$0xff] }
   0x4   :  { %1416 = vmatprep.subr.mxu1 %v31_v1  ;;  %1292 = vmatpush3.msra.mxu0 %v32_v0  ;;  %v30_v10 = vld [vmem:[%s1827_s0 + $0x38] sm:$0xff]  ;;  %v1571_v11 = vld [vmem:[%s1828_s2 + $0x8] sm:$0xff]  ;;  %v1580_v12 = vld [vmem:[%s1828_s2] sm:$0xff]  ;;  %vm184_vm2 = vcmp.ge.s32.totalorder %v183_v28, 64  ;;  %vm185_vm3 = vcmp.lt.s32.totalorder %v183_v28, 96 }
   0x5   :  { %1418 = vmatpush3.msra.mxu1 %v31_v1  ;;  %1293 = vmatprep.subr.mxu0 %v31_v1  ;;  %v1616_v18 = vld [vmem:[%s1829_s3] ss:$0 sm:$0xff]  ;;  %vm1621_vm4 = vmand %vm184_vm2, %vm185_vm3  ;;  %s1489_s3 = smov 64   ;;  %v25_v57 = vld [vmem:[%s1827_s0 + $0x10] sm:$0xff] }
   0x6   :  { %1302 = vmatmul.mubr.msk.f32.vlgmr.msra.gmra.mxu1 %vm40_vm0, %v28_v3  ;;  %1307 = vmatprep.subr.mxu1 %v1487_v6  ;;  %v26_v58 = vld [vmem:[%s1827_s0 + $0x18] sm:$0xff] }
   0x7   :  { %1308 = vmatpush3.msra.mxu1 %v1542_v4  ;;  %1294 = vmatpush3.msra.mxu0 %v31_v1 }
   0x8   :  { %1295 = vmatprep.mubr.msk.f32.mxu0 %vm40_vm0, %v23_v5  ;;  %1309 = vmatprep.subr.mxu1 %v1487_v6 }
   0x9   :  { %1296 = vmatmul.mubr.msk.f32.vlgmr.msra.gmra.mxu0 %vm40_vm0, %v24_v7  ;;  %1304 = vmatprep.mubr.msk.f32.mxu1 %vm40_vm0, %v29_v8 }
   0xa   :  { %1310 = vmatpush3.msra.mxu1 %v1559_v9  ;;  %1329 = vmatprep.subr.mxu0 %v1487_v6 }
   0xb   :  { %1305 = vmatmul.mubr.msk.f32.gmra.mxu1 %vm40_vm0, %v30_v10  ;;  %1311 = vmatprep.subr.mxu1 %v1487_v6 }
   0xc   :  { %1312 = vmatpush3.msra.mxu1 %v1571_v11  ;;  %1315 = vmatprep.mubr.msk.f32.mxu1 %vm1488_vm1, %v1487_v6 }
   0xd   :  { %1313 = vmatprep.subr.mxu1 %v1487_v6  ;;  %1330 = vmatpush3.msra.mxu0 %v1542_v4 }
   0xe   :  { %1314 = vmatpush3.msra.mxu1 %v1580_v12  ;;  %1331 = vmatprep.subr.mxu0 %v1487_v6 }
   0xf   :  { %1316 = vmatmul.mubr.f32.vlgmr.msra.gmra.mxu1 %v1487_v6  ;;  %1318 = vmatprep.subr.mxu1 %v1487_v6 }
  0x10   :  { %1319 = vmatpush3.msra.mxu1 %v1542_v4  ;;  %1326 = vmatprep.mubr.msk.f32.mxu1 %vm1488_vm1, %v1487_v6 }
  0x11   :  { %1320 = vmatprep.subr.mxu1 %v1487_v6  ;;  %1332 = vmatpush3.msra.mxu0 %v1559_v9 }
  0x12   :  { %1321 = vmatpush3.msra.mxu1 %v1559_v9  ;;  %1333 = vmatprep.subr.mxu0 %v1487_v6 }
  0x13   :  { %1322 = vmatprep.subr.mxu1 %v1487_v6  ;;  %1334 = vmatpush3.msra.mxu0 %v1571_v11 }
  0x14   :  { %1323 = vmatpush3.msra.mxu1 %v1571_v11  ;;  %1335 = vmatprep.subr.mxu0 %v1487_v6 }
  0x15   :  { %1324 = vmatprep.subr.mxu1 %v1487_v6  ;;  %1336 = vmatpush3.msra.mxu0 %v1580_v12 }
  0x16   :  { %1325 = vmatpush3.msra.mxu1 %v1580_v12  ;;  %1351 = vmatprep.subr.mxu0 %v1487_v6 }
  0x17   :  { %1340 = vmatprep.subr.mxu1 %v1487_v6  ;;  %1298 = vmatprep.mubr.msk.f32.mxu0 %vm40_vm0, %v25_v57 }
  0x18   :  { %1299 = vmatmul.mubr.msk.f32.gmra.mxu0 %vm40_vm0, %v26_v58 }
  0x19   :  { %1337 = vmatprep.mubr.msk.f32.mxu0 %vm1488_vm1, %v1487_v6 }
  0xc6   :  { %v1607_v13 = vpop.f32.mrf.mxu1 }
  0xc8   :  { %v1609_v14 = vpop.f32.mrf.mxu1 }
  0xc9   :  { %v1297_v15 = vpop.f32.mrf.mxu0 }
  0xca   :  { %v137_v42 = vadd.f32 %v1297_v15, %v1616_v18 }
  0xcb   :  { %v1611_v16 = vpop.f32.mrf.mxu1  ;;  %v131_v17 = vpop.f32.mrf.mxu0 }
  0xcc   :  { %v132_v20 = vadd.f32 %v1616_v18, %v131_v17 }
  0xcd   :  { %v1618_v19 = vpop.f32.mrf.mxu1 }
  0xcf   :  { %v258_v21 = vpop.f32.mrf.mxu1 }
  0xd0   :  { %v262_v22 = vadd.f32 %v258_v21, %v132_v20 }
  0xd1   :  { %v1317_v23 = vpop.f32.mrf.mxu1 }
  0xd2   :  { %v1205_v24 = vmul.f32 -1.442695, %v262_v22 }
  0xd4   :  { %1423 = vpow2.f32 %v1205_v24 }
  0xd5   :  { %1425 = vtanh.f32 %v262_v22 }
  0xd8   :  { %v1300_v63 = vpop.f32.mrf.mxu0 }
  0xda   :  { %v141_v0 = vpop.f32.mrf.mxu0 }
  0xdb   :  { %v142_v1 = vadd.f32 %v1616_v18, %v141_v0 }
  0xe1   :  { %v1424_v25 = vpop.eup %1423 }
  0xe2   :  { %v267_v26 = vadd.f32 1.0, %v1424_v25  ;;  %v1426_v30 = vpop.eup %1425 }
  0xe4   :  { %1427 = vrcp.f32 %v267_v26 }
  0xf1   :  { %v1428_v31 = vpop.eup %1427 }
  0xf2   :  { %v270_v32 = vsel %vm1621_vm4, %v1426_v30, %v1428_v31  ;;  %v147_v31 = vadd.f32 %v1300_v63, %v1616_v18 }
  0xf3   :  { %273 = vrot.lane.b32.xlu0 %v270_v32, %s1489_s3  ;;  %v271_v35 = vmul.f32 0.0, %v270_v32 }
 0x165   :  { %v274_v33 = vpop.permute.xlu0 %273 }
 0x166   :  { %v276_v34 = vmul.f32 %v274_v33, %v270_v32 }
 0x168   :  { %278 = vrot.lane.b32.xlu0 %v276_v34, %s1490_s21 }
 0x1da   :  { %v279_v36 = vpop.permute.xlu0 %278 }
 0x1db   :  { %v281_v37 = vadd.f32 %v279_v36, %v271_v35 }
 0x1dd   :  { %1429 = vtanh.f32 %v281_v37 }
 0x1ea   :  { %v1430_v38 = vpop.eup %1429 }
 0x1eb   :  { %284 = vrot.lane.b32.xlu1 %v1430_v38, %s1489_s3 }
 0x25d   :  { %v285_v39 = vpop.permute.xlu1 %284 }
 0x25e   :  { %v287_v40 = vmul.f32 %v285_v39, %v270_v32 }
 0x260   :  { %289 = vrot.lane.b32.xlu1 %v287_v40, %s1490_s21 }
 0x2d2   :  { %v290_v41 = vpop.permute.xlu1 %289 }
 0x2d3   :  { %292 = vst.msk [vmem:[#allocation3] sm:$0xff] %vm188_vm5, %v290_v41  ;;  %1327 = vmatmul.mubr.msk.f32.vlgmr.msra.gmra.mxu1 %vm188_vm5, %v290_v41 }
 0x2d4   :  { %1341 = vmatpush3.msra.mxu1 %v1542_v4  ;;  %1348 = vmatprep.mubr.msk.f32.mxu1 %vm1488_vm1, %v1487_v6 }
 0x2d5   :  { %1342 = vmatprep.subr.mxu1 %v1487_v6 }
 0x2d6   :  { %1343 = vmatpush3.msra.mxu1 %v1559_v9 }
 0x2d7   :  { %1344 = vmatprep.subr.mxu1 %v1487_v6 }
 0x2d8   :  { %1345 = vmatpush3.msra.mxu1 %v1571_v11 }
 0x2d9   :  { %1346 = vmatprep.subr.mxu1 %v1487_v6 }
 0x2da   :  { %1347 = vmatpush3.msra.mxu1 %v1580_v12 }
 0x2db   :  { %1362 = vmatprep.subr.mxu1 %v1487_v6 }
 0x393   :  { %v363_v43 = vpop.f32.mrf.mxu1 }
 0x394   :  { %v367_v44 = vadd.f32 %v363_v43, %v137_v42 }
 0x395   :  { %v1328_v45 = vpop.f32.mrf.mxu1 }
 0x396   :  { %v1207_v46 = vmul.f32 -1.442695, %v367_v44 }
 0x398   :  { %1431 = vpow2.f32 %v1207_v46 }
 0x399   :  { %1433 = vtanh.f32 %v367_v44 }
 0x3a5   :  { %v1432_v47 = vpop.eup %1431 }
 0x3a6   :  { %v372_v48 = vadd.f32 1.0, %v1432_v47  ;;  %v1434_v49 = vpop.eup %1433 }
 0x3a8   :  { %1435 = vrcp.f32 %v372_v48 }
 0x3b5   :  { %v1436_v50 = vpop.eup %1435 }
 0x3b6   :  { %v375_v51 = vsel %vm1621_vm4, %v1434_v49, %v1436_v50  ;;  %v152_v50 = vadd.f32 %v1616_v18, %v1609_v14 }
 0x3b7   :  { %378 = vrot.lane.b32.xlu0 %v375_v51, %s1489_s3  ;;  %v376_v54 = vmul.f32 %v375_v51, %v281_v37 }
 0x429   :  { %v379_v52 = vpop.permute.xlu0 %378 }
 0x42a   :  { %v381_v53 = vmul.f32 %v379_v52, %v375_v51 }
 0x42c   :  { %383 = vrot.lane.b32.xlu1 %v381_v53, %s1490_s21 }
 0x49e   :  { %v384_v55 = vpop.permute.xlu1 %383 }
 0x49f   :  { %v386_v56 = vadd.f32 %v384_v55, %v376_v54 }
 0x4a1   :  { %1437 = vtanh.f32 %v386_v56 }
 0x4ae   :  { %v1438_v59 = vpop.eup %1437 }
 0x4af   :  { %389 = vrot.lane.b32.xlu0 %v1438_v59, %s1489_s3 }
 0x521   :  { %v390_v60 = vpop.permute.xlu0 %389 }
 0x522   :  { %v392_v61 = vmul.f32 %v390_v60, %v375_v51 }
 0x524   :  { %394 = vrot.lane.b32.xlu1 %v392_v61, %s1490_s21 }
 0x596   :  { %v395_v62 = vpop.permute.xlu1 %394 }
 0x597   :  { %398 = vst.msk [vmem:[#allocation3 + $0x8] sm:$0xff] %vm188_vm5, %v395_v62  ;;  %1338 = vmatmul.mubr.msk.f32.vlgmr.msra.gmra.mxu0 %vm188_vm5, %v395_v62 }
 0x598   :  { %1352 = vmatpush3.msra.mxu0 %v1542_v4  ;;  %1359 = vmatprep.mubr.msk.f32.mxu0 %vm1488_vm1, %v1487_v6 }
 0x599   :  { %1353 = vmatprep.subr.mxu0 %v1487_v6 }
 0x59a   :  { %1354 = vmatpush3.msra.mxu0 %v1559_v9 }
 0x59b   :  { %1355 = vmatprep.subr.mxu0 %v1487_v6 }
 0x59c   :  { %1356 = vmatpush3.msra.mxu0 %v1571_v11 }
 0x59d   :  { %1357 = vmatprep.subr.mxu0 %v1487_v6 }
 0x59e   :  { %1358 = vmatpush3.msra.mxu0 %v1580_v12 }
 0x59f   :  { %1373 = vmatprep.subr.mxu0 %v1487_v6 }
 0x657   :  { %v469_v2 = vpop.f32.mrf.mxu0 }
 0x658   :  { %v473_v3 = vadd.f32 %v469_v2, %v142_v1 }
 0x659   :  { %v1339_v5 = vpop.f32.mrf.mxu0 }
 0x65a   :  { %v1209_v7 = vmul.f32 -1.442695, %v473_v3  ;;  %v157_v5 = vadd.f32 %v1607_v13, %v1616_v18 }
 0x65c   :  { %1439 = vpow2.f32 %v1209_v7 }
 0x65d   :  { %1441 = vtanh.f32 %v473_v3 }
 0x669   :  { %v1440_v8 = vpop.eup %1439 }
 0x66a   :  { %v478_v10 = vadd.f32 1.0, %v1440_v8  ;;  %v1442_v15 = vpop.eup %1441 }
 0x66c   :  { %1443 = vrcp.f32 %v478_v10 }
 0x679   :  { %v1444_v17 = vpop.eup %1443 }
 0x67a   :  { %v481_v20 = vsel %vm1621_vm4, %v1442_v15, %v1444_v17 }
 0x67b   :  { %484 = vrot.lane.b32.xlu0 %v481_v20, %s1489_s3  ;;  %v482_v23 = vmul.f32 %v481_v20, %v386_v56 }
 0x6ed   :  { %v485_v21 = vpop.permute.xlu0 %484 }
 0x6ee   :  { %v487_v22 = vmul.f32 %v485_v21, %v481_v20 }
 0x6f0   :  { %489 = vrot.lane.b32.xlu1 %v487_v22, %s1490_s21 }
 0x762   :  { %v490_v24 = vpop.permute.xlu1 %489 }
 0x763   :  { %v492_v25 = vadd.f32 %v490_v24, %v482_v23  ;;  %v1046_v23 = vld [vmem:[%s1830_s4 + $0x18] sm:$0xff] }
 0x765   :  { %1445 = vtanh.f32 %v492_v25 }
 0x772   :  { %v1446_v26 = vpop.eup %1445 }
 0x773   :  { %495 = vrot.lane.b32.xlu0 %v1446_v26, %s1489_s3 }
 0x7e5   :  { %v496_v27 = vpop.permute.xlu0 %495 }
 0x7e6   :  { %v498_v28 = vmul.f32 %v496_v27, %v481_v20 }
 0x7e8   :  { %500 = vrot.lane.b32.xlu1 %v498_v28, %s1490_s21  ;;  %v1045_v28 = vld [vmem:[%s1830_s4 + $0x10] sm:$0xff] }
 0x85a   :  { %v501_v30 = vpop.permute.xlu1 %500 }
 0x85b   :  { %504 = vst.msk [vmem:[#allocation3 + $0x10] sm:$0xff] %vm188_vm5, %v501_v30  ;;  %1349 = vmatmul.mubr.msk.f32.vlgmr.msra.gmra.mxu1 %vm188_vm5, %v501_v30  ;;  %v1035_v30 = vld [vmem:[#allocation3] sm:$0xff] }
 0x85c   :  { %1363 = vmatpush3.msra.mxu1 %v1542_v4  ;;  %1370 = vmatprep.mubr.msk.f32.mxu1 %vm1488_vm1, %v1487_v6 }
 0x85d   :  { %1364 = vmatprep.subr.mxu1 %v1487_v6 }
 0x85e   :  { %1365 = vmatpush3.msra.mxu1 %v1559_v9 }
 0x85f   :  { %1366 = vmatprep.subr.mxu1 %v1487_v6 }
 0x860   :  { %1367 = vmatpush3.msra.mxu1 %v1571_v11 }
 0x861   :  { %1368 = vmatprep.subr.mxu1 %v1487_v6 }
 0x862   :  { %1369 = vmatpush3.msra.mxu1 %v1580_v12 }
 0x863   :  { %1384 = vmatprep.subr.mxu1 %v1487_v6 }
 0x91b   :  { %v575_v32 = vpop.f32.mrf.mxu1 }
 0x91c   :  { %v579_v33 = vadd.f32 %v575_v32, %v147_v31  ;;  %v1044_v31 = vld [vmem:[%s1830_s4 + $0x8] sm:$0xff]  ;;  %v1043_v32 = vld [vmem:[%s1830_s4] sm:$0xff] }
 0x91d   :  { %v1350_v34 = vpop.f32.mrf.mxu1 }
 0x91e   :  { %v1211_v35 = vmul.f32 -1.442695, %v579_v33  ;;  %v1037_v34 = vld [vmem:[#allocation3 + $0x10] sm:$0xff] }
 0x920   :  { %1447 = vpow2.f32 %v1211_v35 }
 0x921   :  { %1449 = vtanh.f32 %v579_v33  ;;  %v1036_v33 = vld [vmem:[#allocation3 + $0x8] sm:$0xff] }
 0x92d   :  { %v1448_v36 = vpop.eup %1447 }
 0x92e   :  { %v584_v37 = vadd.f32 1.0, %v1448_v36  ;;  %v1450_v38 = vpop.eup %1449 }
 0x930   :  { %1451 = vrcp.f32 %v584_v37 }
 0x93d   :  { %v1452_v39 = vpop.eup %1451 }
 0x93e   :  { %v587_v40 = vsel %vm1621_vm4, %v1450_v38, %v1452_v39  ;;  %v162_v38 = vadd.f32 %v1616_v18, %v1618_v19 }
 0x93f   :  { %590 = vrot.lane.b32.xlu0 %v587_v40, %s1489_s3  ;;  %v588_v43 = vmul.f32 %v587_v40, %v492_v25 }
 0x9b1   :  { %v591_v41 = vpop.permute.xlu0 %590 }
 0x9b2   :  { %v593_v42 = vmul.f32 %v591_v41, %v587_v40 }
 0x9b4   :  { %595 = vrot.lane.b32.xlu1 %v593_v42, %s1490_s21 }
 0xa26   :  { %v596_v44 = vpop.permute.xlu1 %595 }
 0xa27   :  { %v598_v45 = vadd.f32 %v596_v44, %v588_v43  ;;  %v1764_v43 = vld [vmem:[%s1831_s5] ss:$0 sm:$0xff] }
 0xa29   :  { %1453 = vtanh.f32 %v598_v45 }
 0xa36   :  { %v1454_v46 = vpop.eup %1453 }
 0xa37   :  { %601 = vrot.lane.b32.xlu0 %v1454_v46, %s1489_s3 }
 0xaa9   :  { %v602_v47 = vpop.permute.xlu0 %601 }
 0xaaa   :  { %v604_v48 = vmul.f32 %v602_v47, %v587_v40 }
 0xaac   :  { %606 = vrot.lane.b32.xlu1 %v604_v48, %s1490_s21 }
 0xb1e   :  { %v607_v49 = vpop.permute.xlu1 %606 }
 0xb1f   :  { %610 = vst.msk [vmem:[#allocation3 + $0x18] sm:$0xff] %vm188_vm5, %v607_v49  ;;  %1360 = vmatmul.mubr.msk.f32.vlgmr.msra.gmra.mxu0 %vm188_vm5, %v607_v49 }
 0xb20   :  { %1374 = vmatpush3.msra.mxu0 %v1542_v4  ;;  %1381 = vmatprep.mubr.msk.f32.mxu0 %vm1488_vm1, %v1487_v6 }
 0xb21   :  { %1375 = vmatprep.subr.mxu0 %v1487_v6 }
 0xb22   :  { %1376 = vmatpush3.msra.mxu0 %v1559_v9 }
 0xb23   :  { %1377 = vmatprep.subr.mxu0 %v1487_v6 }
 0xb24   :  { %1378 = vmatpush3.msra.mxu0 %v1571_v11 }
 0xb25   :  { %1379 = vmatprep.subr.mxu0 %v1487_v6 }
 0xb26   :  { %1380 = vmatpush3.msra.mxu0 %v1580_v12  ;;  %v1038_v35 = vld [vmem:[#allocation3 + $0x18] sm:$0xff] }
 0xb27   :  { %1395 = vmatprep.subr.mxu0 %v1046_v23 }
 0xbdf   :  { %v681_v51 = vpop.f32.mrf.mxu0 }
 0xbe0   :  { %v685_v52 = vadd.f32 %v681_v51, %v152_v50 }
 0xbe1   :  { %v1361_v53 = vpop.f32.mrf.mxu0 }
 0xbe2   :  { %v1213_v54 = vmul.f32 -1.442695, %v685_v52 }
 0xbe4   :  { %1455 = vpow2.f32 %v1213_v54 }
 0xbe5   :  { %1457 = vtanh.f32 %v685_v52 }
 0xbf1   :  { %v1456_v55 = vpop.eup %1455 }
 0xbf2   :  { %v690_v56 = vadd.f32 1.0, %v1456_v55  ;;  %v1458_v57 = vpop.eup %1457 }
 0xbf4   :  { %1459 = vrcp.f32 %v690_v56 }
 0xc01   :  { %v1460_v58 = vpop.eup %1459 }
 0xc02   :  { %v693_v59 = vsel %vm1621_vm4, %v1458_v57, %v1460_v58 }
 0xc03   :  { %696 = vrot.lane.b32.xlu0 %v693_v59, %s1489_s3  ;;  %v694_v14 = vmul.f32 %v693_v59, %v598_v45 }
 0xc75   :  { %v697_v60 = vpop.permute.xlu0 %696 }
 0xc76   :  { %v699_v61 = vmul.f32 %v697_v60, %v693_v59 }
 0xc78   :  { %701 = vrot.lane.b32.xlu1 %v699_v61, %s1490_s21 }
 0xcea   :  { %v702_v62 = vpop.permute.xlu1 %701 }
 0xceb   :  { %v704_v63 = vadd.f32 %v702_v62, %v694_v14 }
 0xced   :  { %1461 = vtanh.f32 %v704_v63 }
 0xcfa   :  { %v1462_v0 = vpop.eup %1461 }
 0xcfb   :  { %707 = vrot.lane.b32.xlu0 %v1462_v0, %s1489_s3 }
 0xd6d   :  { %v708_v1 = vpop.permute.xlu0 %707 }
 0xd6e   :  { %v710_v2 = vmul.f32 %v708_v1, %v693_v59 }
 0xd70   :  { %712 = vrot.lane.b32.xlu1 %v710_v2, %s1490_s21 }
 0xde2   :  { %v713_v3 = vpop.permute.xlu1 %712 }
 0xde3   :  { %716 = vst.msk [vmem:[#allocation3 + $0x20] sm:$0xff] %vm188_vm5, %v713_v3  ;;  %1371 = vmatmul.mubr.msk.f32.vlgmr.msra.gmra.mxu1 %vm188_vm5, %v713_v3 }
 0xde4   :  { %1385 = vmatpush3.msra.mxu1 %v1542_v4  ;;  %1392 = vmatprep.mubr.msk.f32.mxu1 %vm1488_vm1, %v1487_v6 }
 0xde5   :  { %1386 = vmatprep.subr.mxu1 %v1487_v6 }
 0xde6   :  { %1387 = vmatpush3.msra.mxu1 %v1559_v9 }
 0xde7   :  { %1388 = vmatprep.subr.mxu1 %v1487_v6 }
 0xde8   :  { %1389 = vmatpush3.msra.mxu1 %v1571_v11 }
 0xde9   :  { %1390 = vmatprep.subr.mxu1 %v1487_v6 }
 0xdea   :  { %1391 = vmatpush3.msra.mxu1 %v1580_v12  ;;  %v1039_v36 = vld [vmem:[#allocation3 + $0x20] sm:$0xff] }
 0xea3   :  { %v787_v7 = vpop.f32.mrf.mxu1 }
 0xea4   :  { %v791_v4 = vadd.f32 %v787_v7, %v157_v5  ;;  %v167_v7 = vadd.f32 %v1611_v16, %v1616_v18 }
 0xea5   :  { %v1372_v8 = vpop.f32.mrf.mxu1 }
 0xea6   :  { %v1215_v10 = vmul.f32 -1.442695, %v791_v4 }
 0xea8   :  { %1463 = vpow2.f32 %v1215_v10 }
 0xea9   :  { %1465 = vtanh.f32 %v791_v4 }
 0xeb5   :  { %v1464_v15 = vpop.eup %1463 }
 0xeb6   :  { %v796_v17 = vadd.f32 1.0, %v1464_v15  ;;  %v1466_v9 = vpop.eup %1465 }
 0xeb8   :  { %1467 = vrcp.f32 %v796_v17 }
 0xec5   :  { %v1468_v20 = vpop.eup %1467 }
 0xec6   :  { %v799_v11 = vsel %vm1621_vm4, %v1466_v9, %v1468_v20 }
 0xec7   :  { %802 = vrot.lane.b32.xlu0 %v799_v11, %s1489_s3  ;;  %v800_v13 = vmul.f32 %v799_v11, %v704_v63 }
 0xf39   :  { %v803_v6 = vpop.permute.xlu0 %802 }
 0xf3a   :  { %v805_v12 = vmul.f32 %v803_v6, %v799_v11 }
 0xf3c   :  { %807 = vrot.lane.b32.xlu1 %v805_v12, %s1490_s21 }
 0xfae   :  { %v808_v21 = vpop.permute.xlu1 %807 }
 0xfaf   :  { %v1734_v22 = vadd.f32 %v808_v21, %v800_v13 }
 0xfb1   :  { %1469 = vtanh.f32 %v1734_v22 }
 0xfbe   :  { %v1470_v24 = vpop.eup %1469 }
 0xfbf   :  { %813 = vrot.lane.b32.xlu0 %v1470_v24, %s1489_s3 }
0x1031   :  { %v814_v25 = vpop.permute.xlu0 %813 }
0x1032   :  { %v816_v26 = vmul.f32 %v814_v25, %v799_v11 }
0x1034   :  { %818 = vrot.lane.b32.xlu1 %v816_v26, %s1490_s21 }
0x10a6   :  { %v819_v27 = vpop.permute.xlu1 %818 }
0x10a7   :  { %822 = vst.msk [vmem:[#allocation3 + $0x28] sm:$0xff] %vm188_vm5, %v819_v27  ;;  %1382 = vmatmul.mubr.msk.f32.vlgmr.msra.gmra.mxu0 %vm188_vm5, %v819_v27 }
0x10a8   :  { %1396 = vmatpush3.msra.mxu0 %v1046_v23  ;;  %1403 = vmatprep.mubr.msk.f32.mxu0 %vm188_vm5, %v1035_v30 }
0x10a9   :  { %1397 = vmatprep.subr.mxu0 %v1045_v28 }
0x10aa   :  { %1398 = vmatpush3.msra.mxu0 %v1045_v28 }
0x10ab   :  { %1399 = vmatprep.subr.mxu0 %v1044_v31 }
0x10ac   :  { %1400 = vmatpush3.msra.mxu0 %v1044_v31 }
0x10ad   :  { %1401 = vmatprep.subr.mxu0 %v1043_v32 }
0x10ae   :  { %1402 = vmatpush3.msra.mxu0 %v1043_v32  ;;  %v1040_v37 = vld [vmem:[#allocation3 + $0x28] sm:$0xff] }
0x10af   :  { %1404 = vmatmul.mubr.msk.f32.vlgmr.msra.gmra.mxu0 %vm188_vm5, %v1036_v33 }
0x10b0   :  { %1406 = vmatprep.mubr.msk.f32.mxu0 %vm188_vm5, %v1037_v34 }
0x10b3   :  { %1407 = vmatmul.mubr.msk.f32.gmra.mxu0 %vm188_vm5, %v1038_v35 }
0x10b4   :  { %1409 = vmatprep.mubr.msk.f32.mxu0 %vm188_vm5, %v1039_v36 }
0x10b7   :  { %1410 = vmatmul.mubr.msk.f32.gmra.mxu0 %vm188_vm5, %v1040_v37 }
0x1167   :  { %v893_v39 = vpop.f32.mrf.mxu0 }
0x1168   :  { %v897_v40 = vadd.f32 %v893_v39, %v162_v38 }
0x1169   :  { %v1383_v41 = vpop.f32.mrf.mxu0 }
0x116a   :  { %v1217_v42 = vmul.f32 -1.442695, %v897_v40 }
0x116c   :  { %1471 = vpow2.f32 %v1217_v42 }
0x116d   :  { %1473 = vtanh.f32 %v897_v40 }
0x116f   :  { %v1405_v44 = vpop.f32.mrf.mxu0 }
0x1170   :  { %v1150_v45 = vadd.f32 %v1405_v44, %v1764_v43 }
0x1171   :  { %v1144_v46 = vpop.f32.mrf.mxu0 }
0x1172   :  { %1185 = vst.msk [vmem:[%s1832_s6 + $0x8] sm:$0xff] %vm1183_vm6, %v1150_v45  ;;  %v1145_v19 = vadd.f32 %v1764_v43, %v1144_v46 }
0x1173   :  { %v1408_v47 = vpop.f32.mrf.mxu0 }
0x1174   :  { %1184 = vst.msk [vmem:[%s1832_s6] sm:$0xff] %vm1183_vm6, %v1145_v19  ;;  %v1160_v48 = vadd.f32 %v1408_v47, %v1764_v43 }
0x1175   :  { %v1154_v49 = vpop.f32.mrf.mxu0 }
0x1176   :  { %1187 = vst.msk [vmem:[%s1832_s6 + $0x18] sm:$0xff] %vm1183_vm6, %v1160_v48  ;;  %v1155_v50 = vadd.f32 %v1764_v43, %v1154_v49 }
0x1177   :  { %v1411_v51 = vpop.f32.mrf.mxu0 }
0x1178   :  { %1186 = vst.msk [vmem:[%s1832_s6 + $0x10] sm:$0xff] %vm1183_vm6, %v1155_v50  ;;  %v1170_v52 = vadd.f32 %v1411_v51, %v1764_v43 }
0x1179   :  { %v1472_v53 = vpop.eup %1471  ;;  %v1164_v54 = vpop.f32.mrf.mxu0 }
0x117a   :  { %v902_v55 = vadd.f32 1.0, %v1472_v53  ;;  %1189 = vst.msk [vmem:[%s1832_s6 + $0x28] sm:$0xff] %vm1183_vm6, %v1170_v52  ;;  %v1165_v56 = vadd.f32 %v1764_v43, %v1164_v54  ;;  %v1474_v57 = vpop.eup %1473 }
0x117c   :  { %1475 = vrcp.f32 %v902_v55  ;;  %1188 = vst.msk [vmem:[%s1832_s6 + $0x20] sm:$0xff] %vm1183_vm6, %v1165_v56 }
0x1189   :  { %v1476_v58 = vpop.eup %1475 }
0x118a   :  { %v905_v59 = vsel %vm1621_vm4, %v1474_v57, %v1476_v58 }
0x118b   :  { %908 = vrot.lane.b32.xlu0 %v905_v59, %s1489_s3  ;;  %v906_v14 = vmul.f32 %v905_v59, %v1734_v22 }
0x11fd   :  { %v909_v60 = vpop.permute.xlu0 %908 }
0x11fe   :  { %v911_v61 = vmul.f32 %v909_v60, %v905_v59 }
0x1200   :  { %913 = vrot.lane.b32.xlu1 %v911_v61, %s1490_s21 }
0x1272   :  { %v914_v62 = vpop.permute.xlu1 %913 }
0x1273   :  { %v916_v63 = vadd.f32 %v914_v62, %v906_v14 }
0x1275   :  { %1477 = vtanh.f32 %v916_v63 }
0x1282   :  { %v1478_v0 = vpop.eup %1477 }
0x1283   :  { %919 = vrot.lane.b32.xlu0 %v1478_v0, %s1489_s3 }
0x12f5   :  { %v920_v1 = vpop.permute.xlu0 %919 }
0x12f6   :  { %v922_v2 = vmul.f32 %v920_v1, %v905_v59 }
0x12f8   :  { %924 = vrot.lane.b32.xlu1 %v922_v2, %s1490_s21 }
0x136a   :  { %v925_v3 = vpop.permute.xlu1 %924 }
0x136b   :  { %928 = vst.msk [vmem:[#allocation3 + $0x30] sm:$0xff] %vm188_vm5, %v925_v3  ;;  %1393 = vmatmul.mubr.msk.f32.vlgmr.msra.gmra.mxu1 %vm188_vm5, %v925_v3 }
0x1372   :  { %v1041_v5 = vld [vmem:[#allocation3 + $0x30] sm:$0xff] }
0x1373   :  { %1412 = vmatprep.mubr.msk.f32.mxu0 %vm188_vm5, %v1041_v5 }
0x142b   :  { %v999_v4 = vpop.f32.mrf.mxu1 }
0x142c   :  { %v1003_v8 = vadd.f32 %v999_v4, %v167_v7 }
0x142d   :  { %v1394_v10 = vpop.f32.mrf.mxu1 }
0x142e   :  { %v1219_v15 = vmul.f32 -1.442695, %v1003_v8 }
0x1430   :  { %1479 = vpow2.f32 %v1219_v15 }
0x1431   :  { %1481 = vtanh.f32 %v1003_v8 }
0x143d   :  { %v1480_v17 = vpop.eup %1479 }
0x143e   :  { %v1008_v9 = vadd.f32 1.0, %v1480_v17  ;;  %v1482_v20 = vpop.eup %1481 }
0x1440   :  { %1483 = vrcp.f32 %v1008_v9 }
0x144d   :  { %v1484_v11 = vpop.eup %1483 }
0x144e   :  { %v1011_v6 = vsel %vm1621_vm4, %v1482_v20, %v1484_v11 }
0x144f   :  { %1014 = vrot.lane.b32.xlu0 %v1011_v6, %s1489_s3  ;;  %v1012_v16 = vmul.f32 %v1011_v6, %v916_v63 }
0x14c1   :  { %v1015_v12 = vpop.permute.xlu0 %1014 }
0x14c2   :  { %v1017_v13 = vmul.f32 %v1015_v12, %v1011_v6 }
0x14c4   :  { %1019 = vrot.lane.b32.xlu1 %v1017_v13, %s1490_s21 }
0x1536   :  { %v1020_v18 = vpop.permute.xlu1 %1019 }
0x1537   :  { %v1022_v21 = vadd.f32 %v1020_v18, %v1012_v16 }
0x1539   :  { %1485 = vtanh.f32 %v1022_v21 }
0x1546   :  { %v1486_v22 = vpop.eup %1485 }
0x1547   :  { %1025 = vrot.lane.b32.xlu0 %v1486_v22, %s1489_s3 }
0x15b9   :  { %v1026_v23 = vpop.permute.xlu0 %1025 }
0x15ba   :  { %v1028_v24 = vmul.f32 %v1026_v23, %v1011_v6 }
0x15bc   :  { %1030 = vrot.lane.b32.xlu1 %v1028_v24, %s1490_s21 }
0x162e   :  { %v1031_v25 = vpop.permute.xlu1 %1030 }
0x162f   :  { %1034 = vst.msk [vmem:[#allocation3 + $0x38] sm:$0xff] %vm188_vm5, %v1031_v25 }
0x1636   :  { %v1042_v29 = vld [vmem:[#allocation3 + $0x38] sm:$0xff] }
0x1637   :  { %1413 = vmatmul.mubr.msk.f32.gmra.mxu0 %vm188_vm5, %v1042_v29 }
0x16f7   :  { %v1414_v26 = vpop.f32.mrf.mxu0 }
0x16f8   :  { %v1180_v27 = vadd.f32 %v1414_v26, %v1764_v43 }
0x16f9   :  { %v1174_v28 = vpop.f32.mrf.mxu0 }
0x16fa   :  { %1191 = vst.msk [vmem:[%s1832_s6 + $0x38] sm:$0xff] %vm1183_vm6, %v1180_v27  ;;  %v1175_v30 = vadd.f32 %v1764_v43, %v1174_v28 }
0x16fc   :  { %1190 = vst.msk [vmem:[%s1832_s6 + $0x30] sm:$0xff] %vm1183_vm6, %v1175_v30 }

</bundles_post_ra>
